<compile_context>
chip_gen: v6e
topology: v6e:2x2x1
jax: 0.10.0
libtpu: 0.0.40
codegen_flags: <defaults>
</compile_context>

<pallas_src>
import functools

import jax
import jax.numpy as jnp
from jax.experimental import pallas as pl
from jax.experimental.pallas import tpu as pltpu

HIDDEN = 128      # hidden width of the first Linear
LANES = 128       # lane-padded width of the policy-head output slab
NEG_BIG = -1e30   # bias of padded head lanes -> exp underflows to exactly 0


def policy_kernel(x_ref, w1_ref, b1_ref, w2p_ref, b2p_ref, probs_ref):
    """probs = softmax(relu(x @ W1 + b1) @ W2p + b2p) over the 128 padded lanes."""
    x = x_ref[...].astype(jnp.float32)

    # Hidden layer: ReLU(x @ W1 + b1). K = state_dim is tiny (MXU mostly padding);
    # kept on the MXU for exact numerical parity with the XLA reference path.
    h = jnp.dot(x, w1_ref[...], preferred_element_type=jnp.float32) + b1_ref[...]
    h = jnp.maximum(h, 0.0)

    # Policy head over the lane-padded weights: padded columns have zero weights
    # and bias -1e30, so they contribute exactly zero probability after softmax.
    logits = jnp.dot(h, w2p_ref[...], preferred_element_type=jnp.float32) + b2p_ref[...]
    m = jnp.max(logits, axis=-1, keepdims=True)
    e = jnp.exp(logits - m)
    denom = jnp.sum(e, axis=-1, keepdims=True)
    inv = pl.reciprocal(denom, approx=False)  # divide goes to EUP, off the VALU path
    probs_ref[...] = (e * inv).astype(probs_ref.dtype)


def _pad_policy_head(w2, b2):
    """Pad the (HIDDEN, action_dim) head to a lane-dense (HIDDEN, 128) head."""
    hidden, action_dim = w2.shape
    assert hidden == HIDDEN and action_dim <= LANES
    w2p = jnp.zeros((HIDDEN, LANES), jnp.float32).at[:, :action_dim].set(
        w2.astype(jnp.float32))
    b2p = jnp.full((1, LANES), NEG_BIG, jnp.float32).at[:, :action_dim].set(
        b2.reshape(1, -1).astype(jnp.float32))
    return w2p, b2p


@functools.partial(jax.jit, static_argnames=("batch_tile",))
def policy_net_forward(x, w1, b1, w2, b2, batch_tile=None):
    batch, state_dim = x.shape
    action_dim = w2.shape[1]

    x = x.astype(jnp.float32)
    w1 = w1.astype(jnp.float32)
    b1 = b1.reshape(1, HIDDEN).astype(jnp.float32)
    w2p, b2p = _pad_policy_head(w2, b2)

    out_shape = jax.ShapeDtypeStruct((batch, LANES), jnp.float32)
    vmem = pl.BlockSpec(memory_space=pltpu.MemorySpace.VMEM)

    use_tiled = (
        batch_tile is not None
        and batch_tile < batch
        and batch % batch_tile == 0
        and batch_tile % 8 == 0
    )

    if use_tiled:
        # Throughput path for vectorized env batches: batch-parallel grid axis,
        # weights resident (index_map -> constant block).
        slab = pl.pallas_call(
            policy_kernel,
            out_shape=out_shape,
            grid=(batch // batch_tile,),
            in_specs=[
                pl.BlockSpec((batch_tile, state_dim), lambda i: (i, 0)),
                pl.BlockSpec((state_dim, HIDDEN), lambda i: (0, 0)),
                pl.BlockSpec((1, HIDDEN), lambda i: (0, 0)),
                pl.BlockSpec((HIDDEN, LANES), lambda i: (0, 0)),
                pl.BlockSpec((1, LANES), lambda i: (0, 0)),
            ],
            out_specs=pl.BlockSpec((batch_tile, LANES), lambda i: (i, 0)),
            compiler_params=pltpu.CompilerParams(
                dimension_semantics=("parallel",)),
        )(x, w1, b1, w2p, b2p)
    else:
        # Tiny-batch path: single block, no grid, everything resident in VMEM.
        slab = pl.pallas_call(
            policy_kernel,
            out_shape=out_shape,
            in_specs=[vmem] * 5,
            out_specs=vmem,
        )(x, w1, b1, w2p, b2p)

    # Lane-dense slab -> real action probabilities.
    return slab[:, :action_dim]


def init_params(key, state_dim, action_dim):
    """Deterministic synthetic parameters (uniform, PyTorch-Linear-like scale)."""
    k1, k2, k3, k4 = jax.random.split(key, 4)

    def unif(k, shape, fan_in):
        bound = 1.0 / jnp.sqrt(jnp.float32(fan_in))
        return jax.random.uniform(k, shape, jnp.float32, -bound, bound)

    # Stored as (in, out): kernel computes x @ W + b.
    w1 = unif(k1, (state_dim, HIDDEN), state_dim)
    b1 = unif(k2, (1, HIDDEN), state_dim)
    w2 = unif(k3, (HIDDEN, action_dim), HIDDEN)
    b2 = unif(k4, (1, action_dim), HIDDEN)
    return w1, b1, w2, b2


if __name__ == "__main__":
    # CartPole-ish sizes: state_dim=4, action_dim=2, small batch.
    batch, state_dim, action_dim = 8, 4, 2

    key = jax.random.PRNGKey(0)
    kx, kp, kx2 = jax.random.split(key, 3)
    x = jax.random.normal(kx, (batch, state_dim), jnp.float32)
    w1, b1, w2, b2 = init_params(kp, state_dim, action_dim)

    # Small-batch (single-block, gridless) path.
    probs = policy_net_forward(x, w1, b1, w2, b2)
    jax.block_until_ready(probs)

    h_ref = jnp.maximum(x @ w1 + b1, 0.0)
    probs_ref = jax.nn.softmax(h_ref @ w2 + b2, axis=-1)
    assert probs.shape == (batch, action_dim)
    assert jnp.allclose(probs, probs_ref, atol=1e-5)
    assert jnp.allclose(jnp.sum(probs, axis=-1), 1.0, atol=1e-5)

    # Throughput path: many env states per call, batch-parallel grid axis.
    big_batch = 256
    xb = jax.random.normal(kx2, (big_batch, state_dim), jnp.float32)
    probs_b = policy_net_forward(xb, w1, b1, w2, b2, batch_tile=128)
    jax.block_until_ready(probs_b)

    hb_ref = jnp.maximum(xb @ w1 + b1, 0.0)
    probs_b_ref = jax.nn.softmax(hb_ref @ w2 + b2, axis=-1)
    assert probs_b.shape == (big_batch, action_dim)
    assert jnp.allclose(probs_b, probs_b_ref, atol=1e-5)
    assert jnp.allclose(jnp.sum(probs_b, axis=-1), 1.0, atol=1e-5)

    print("KERNEL_OK")
</pallas_src>

<mosaic_0001>
module attributes {stable_mosaic.version = 11 : i64} {
  func.func @policy_kernel(%arg0: memref<8x4xf32, #tpu.memory_space<vmem>>, %arg1: memref<4x128xf32, #tpu.memory_space<vmem>>, %arg2: memref<1x128xf32, #tpu.memory_space<vmem>>, %arg3: memref<128x128xf32, #tpu.memory_space<vmem>>, %arg4: memref<1x128xf32, #tpu.memory_space<vmem>>, %arg5: memref<8x128xf32, #tpu.memory_space<vmem>>) attributes {dimension_semantics = [], scalar_prefetch = 0 : i64, scratch_operands = 0 : i64, tpu.core_type = #tpu.core_type<tc>} {
    %c0 = arith.constant 0 : index
    %c0_0 = arith.constant 0 : index
    %0 = vector.load %arg0[%c0, %c0_0] : memref<8x4xf32, #tpu.memory_space<vmem>>, vector<8x4xf32>
    %c0_1 = arith.constant 0 : index
    %c0_2 = arith.constant 0 : index
    %1 = vector.load %arg1[%c0_1, %c0_2] : memref<4x128xf32, #tpu.memory_space<vmem>>, vector<4x128xf32>
    %cst = arith.constant dense<0.000000e+00> : vector<8x128xf32>
    %2 = tpu.matmul %0, %1, %cst {dimension_numbers = #tpu.dot_dimension_numbers<[1], [0], [0], [1], [0, 0, 1, 1], [], []>} : vector<8x4xf32>, vector<4x128xf32>, vector<8x128xf32> -> vector<8x128xf32>
    %c0_3 = arith.constant 0 : index
    %c0_4 = arith.constant 0 : index
    %3 = vector.load %arg2[%c0_3, %c0_4] : memref<1x128xf32, #tpu.memory_space<vmem>>, vector<1x128xf32>
    %4 = vector.broadcast %3 : vector<1x128xf32> to vector<8x128xf32>
    %5 = arith.addf %2, %4 : vector<8x128xf32>
    %cst_5 = arith.constant 0.000000e+00 : f32
    %6 = vector.broadcast %cst_5 : f32 to vector<8x128xf32>
    %7 = arith.maximumf %5, %6 : vector<8x128xf32>
    %c0_6 = arith.constant 0 : index
    %c0_7 = arith.constant 0 : index
    %8 = vector.load %arg3[%c0_6, %c0_7] : memref<128x128xf32, #tpu.memory_space<vmem>>, vector<128x128xf32>
    %cst_8 = arith.constant dense<0.000000e+00> : vector<8x128xf32>
    %9 = tpu.matmul %7, %8, %cst_8 {dimension_numbers = #tpu.dot_dimension_numbers<[1], [0], [0], [1], [0, 0, 1, 1], [], []>} : vector<8x128xf32>, vector<128x128xf32>, vector<8x128xf32> -> vector<8x128xf32>
    %c0_9 = arith.constant 0 : index
    %c0_10 = arith.constant 0 : index
    %10 = vector.load %arg4[%c0_9, %c0_10] : memref<1x128xf32, #tpu.memory_space<vmem>>, vector<1x128xf32>
    %11 = vector.broadcast %10 : vector<1x128xf32> to vector<8x128xf32>
    %12 = arith.addf %9, %11 : vector<8x128xf32>
    %cst_11 = arith.constant dense<0xFF800000> : vector<8xf32>
    %13 = vector.multi_reduction <maximumf>, %12, %cst_11 [1] : vector<8x128xf32> to vector<8xf32>
    %14 = vector.shape_cast %13 : vector<8xf32> to vector<8x1xf32>
    %15 = vector.broadcast %14 : vector<8x1xf32> to vector<8x128xf32>
    %16 = arith.subf %12, %15 : vector<8x128xf32>
    %17 = math.exp %16 : vector<8x128xf32>
    %cst_12 = arith.constant dense<0.000000e+00> : vector<8xf32>
    %18 = vector.multi_reduction <add>, %17, %cst_12 [1] : vector<8x128xf32> to vector<8xf32>
    %19 = vector.shape_cast %18 : vector<8xf32> to vector<8x1xf32>
    %20 = tpu.reciprocal %19 : vector<8x1xf32> -> vector<8x1xf32>
    %21 = vector.broadcast %20 : vector<8x1xf32> to vector<8x128xf32>
    %22 = arith.mulf %17, %21 : vector<8x128xf32>
    %c0_13 = arith.constant 0 : index
    %c0_14 = arith.constant 0 : index
    %23 = vector.load %arg5[%c0_13, %c0_14] : memref<8x128xf32, #tpu.memory_space<vmem>>, vector<8x128xf32>
    tpu.vector_store %arg5[%c0_13, %c0_14], %22 {strides = array<i32>} : memref<8x128xf32, #tpu.memory_space<vmem>>, vector<8x128xf32>,
    return
  }
}

</mosaic_0001>

<bundles_post_ra>
// kernel: policy_net_forward.1
= control target key start
LH: loop header
LB: loop body
LE: loop exit
PB: predicated region body
PF: predicated region fallthrough
CT: control target
= control target key end

     0   :  { %vm33_vm0 = vcmask 1043456   ;;  %vm29_vm1 = vcmask 31744   ;;  %v284_v0 = vmov 0.0   ;;  %vm285_vm2 = vmmov 0   ;;  %s379_s1 = inlined_call_operand.vmem [shape: f32[4,128], index: 1, kind: input, shape index: {}]   ;;  %s380_s0 = inlined_call_operand.vmem [shape: f32[8,4], index: 0, kind: input, shape index: {}]   ;;  %s381_s3 = inlined_call_operand.vmem [shape: f32[128,128], index: 3, kind: input, shape index: {}]   ;;  %s382_s2 = inlined_call_operand.vmem [shape: f32[1,128], index: 2, kind: input, shape index: {}]   ;;  %s383_s4 = inlined_call_operand.vmem [shape: f32[1,128], index: 4, kind: input, shape index: {}]   ;;  %s384_s5 = inlined_call_operand.vmem [shape: f32[8,128], index: 5, kind: output, shape index: {}]  }
   0x1   :  { %238 = vmatprep.subr.mxu0 %v284_v0  ;;  %v21_v1 = vld [vmem:[%s379_s1] sm:$0xf]  ;;  %240 = vmatprep.mubr.msk.f32.mxu0 %vm285_vm2, %v284_v0  ;;  %v123_v3 = vld [vmem:[%s381_s3 + $0x78] sm:$0xff]  ;;  %v122_v4 = vld [vmem:[%s381_s3 + $0x70] sm:$0xff] }
   0x2   :  { %v20_v2 = vld [vmem:[%s380_s0] sm:$0xff]  ;;  %239 = vmatpush3.msk.msra.mxu0 %vm33_vm0, %v21_v1  ;;  %243 = vmatprep.subr.mxu1 %v284_v0  ;;  %v121_v5 = vld [vmem:[%s381_s3 + $0x68] sm:$0xff]  ;;  %v119_v7 = vld [vmem:[%s381_s3 + $0x58] sm:$0xff] }
   0x3   :  { %241 = vmatmul.mubr.msk.f32.vlgmr.msra.gmra.mxu0 %vm29_vm1, %v20_v2  ;;  %244 = vmatpush3.msra.mxu1 %v123_v3  ;;  %v120_v6 = vld [vmem:[%s381_s3 + $0x60] sm:$0xff]  ;;  %v118_v8 = vld [vmem:[%s381_s3 + $0x50] sm:$0xff]  ;;  %v117_v9 = vld [vmem:[%s381_s3 + $0x48] sm:$0xff] }
   0x4   :  { %245 = vmatprep.subr.mxu1 %v284_v0  ;;  %275 = vmatprep.mubr.msk.f32.mxu1 %vm285_vm2, %v284_v0  ;;  %v116_v10 = vld [vmem:[%s381_s3 + $0x40] sm:$0xff]  ;;  %v115_v11 = vld [vmem:[%s381_s3 + $0x38] sm:$0xff]  ;;  %v114_v12 = vld [vmem:[%s381_s3 + $0x30] sm:$0xff] }
   0x5   :  { %246 = vmatpush3.msra.mxu1 %v122_v4  ;;  %v113_v13 = vld [vmem:[%s381_s3 + $0x28] sm:$0xff]  ;;  %v112_v14 = vld [vmem:[%s381_s3 + $0x20] sm:$0xff]  ;;  %v111_v15 = vld [vmem:[%s381_s3 + $0x18] sm:$0xff] }
   0x6   :  { %247 = vmatprep.subr.mxu1 %v284_v0  ;;  %v110_v16 = vld [vmem:[%s381_s3 + $0x10] sm:$0xff]  ;;  %v109_v17 = vld [vmem:[%s381_s3 + $0x8] sm:$0xff]  ;;  %v108_v18 = vld [vmem:[%s381_s3] sm:$0xff] }
   0x7   :  { %248 = vmatpush3.msra.mxu1 %v121_v5  ;;  %v215_v19 = vld [vmem:[%s382_s2] ss:$0 sm:$0xff] }
   0x8   :  { %249 = vmatprep.subr.mxu1 %v284_v0  ;;  %v218_v24 = vld [vmem:[%s383_s4] ss:$0 sm:$0xff] }
   0x9   :  { %250 = vmatpush3.msra.mxu1 %v120_v6 }
   0xa   :  { %251 = vmatprep.subr.mxu1 %v284_v0 }
   0xb   :  { %252 = vmatpush3.msra.mxu1 %v119_v7 }
   0xc   :  { %253 = vmatprep.subr.mxu1 %v284_v0 }
   0xd   :  { %254 = vmatpush3.msra.mxu1 %v118_v8 }
   0xe   :  { %255 = vmatprep.subr.mxu1 %v284_v0 }
   0xf   :  { %256 = vmatpush3.msra.mxu1 %v117_v9 }
  0x10   :  { %257 = vmatprep.subr.mxu1 %v284_v0 }
  0x11   :  { %258 = vmatpush3.msra.mxu1 %v116_v10 }
  0x12   :  { %259 = vmatprep.subr.mxu1 %v284_v0 }
  0x13   :  { %260 = vmatpush3.msra.mxu1 %v115_v11 }
  0x14   :  { %261 = vmatprep.subr.mxu1 %v284_v0 }
  0x15   :  { %262 = vmatpush3.msra.mxu1 %v114_v12 }
  0x16   :  { %263 = vmatprep.subr.mxu1 %v284_v0 }
  0x17   :  { %264 = vmatpush3.msra.mxu1 %v113_v13 }
  0x18   :  { %265 = vmatprep.subr.mxu1 %v284_v0 }
  0x19   :  { %266 = vmatpush3.msra.mxu1 %v112_v14 }
  0x1a   :  { %267 = vmatprep.subr.mxu1 %v284_v0 }
  0x1b   :  { %268 = vmatpush3.msra.mxu1 %v111_v15 }
  0x1c   :  { %269 = vmatprep.subr.mxu1 %v284_v0 }
  0x1d   :  { %270 = vmatpush3.msra.mxu1 %v110_v16 }
  0x1e   :  { %271 = vmatprep.subr.mxu1 %v284_v0 }
  0x1f   :  { %272 = vmatpush3.msra.mxu1 %v109_v17 }
  0x20   :  { %273 = vmatprep.subr.mxu1 %v284_v0 }
  0x21   :  { %274 = vmatpush3.msra.mxu1 %v108_v18 }
  0xc3   :  { %v103_v20 = vpop.f32.mrf.mxu0 }
  0xc4   :  { %v104_v21 = vadd.f32 %v215_v19, %v103_v20 }
  0xc5   :  { %v242_v22 = vpop.f32.mrf.mxu0 }
  0xc6   :  { %v107_v23 = vmax.f32 %v104_v21, 0.0 }
  0xc8   :  { %276 = vmatmul.mubr.f32.vlgmr.msra.gmra.mxu1 %v107_v23 }
 0x188   :  { %v197_v25 = vpop.f32.mrf.mxu1 }
 0x189   :  { %v198_v26 = vadd.f32 %v218_v24, %v197_v25 }
 0x18a   :  { %v277_v27 = vpop.f32.mrf.mxu1 }
 0x18b   :  { %201 = vmax.xlane.f32.xlu0 %v198_v26 }
 0x214   :  { %v202_v28 = vpop.xlane.xlu0 %201 }
 0x215   :  { %v203_v29 = vsub.f32 %v198_v26, %v202_v28 }
 0x217   :  { %v204_v30 = vmul.f32 1.442695, %v203_v29 }
 0x219   :  { %280 = vpow2.f32 %v204_v30 }
 0x226   :  { %v281_v31 = vpop.eup %280 }
 0x227   :  { %206 = vadd.xlane.f32.xlu0 %v281_v31 }
 0x2b0   :  { %v207_v32 = vpop.xlane.xlu0 %206 }
 0x2b1   :  { %282 = vrcp.f32 %v207_v32 }
 0x2be   :  { %v283_v33 = vpop.eup %282 }
 0x2bf   :  { %v209_v34 = vmul.f32 %v283_v33, %v281_v31 }
 0x2c1   :  { %210 = vst [vmem:[%s384_s5] sm:$0xff] %v209_v34 }

</bundles_post_ra>
